<compile_context>
chip_gen: v6e
topology: v6e:2x2x1
jax: 0.10.0
libtpu: 0.0.40
codegen_flags: <defaults>
</compile_context>

<pallas_src>
import functools

import jax
import jax.numpy as jnp
from jax.experimental import pallas as pl
from jax.experimental.pallas import tpu as pltpu


def _round_up(x: int, m: int) -> int:
    return (x + m - 1) // m * m


def _ffn_kernel(x_ref, w1_ref, b1_ref, w2_ref, b2_ref, o_ref, acc_ref):
    hk = pl.program_id(1)

    @pl.when(hk == 0)
    def _():
        acc_ref[...] = jnp.zeros_like(acc_ref)

    # h_chunk = relu(x @ W1[:, chunk] + b1[chunk])   (bf16 MXU, f32 accumulate)
    h = jnp.dot(x_ref[...], w1_ref[...], preferred_element_type=jnp.float32)
    h = jnp.maximum(h + b1_ref[...], 0.0)

    # partial out += h_chunk @ W2[chunk, :]
    acc_ref[...] += jnp.dot(h.astype(jnp.bfloat16), w2_ref[...],
                            preferred_element_type=jnp.float32)

    @pl.when(hk == pl.num_programs(1) - 1)
    def _():
        o_ref[...] = (acc_ref[...] + b2_ref[...]).astype(o_ref.dtype)


def _pick_tiles(M, D_pad, H_pad, block_rows, block_hidden, out_itemsize,
                vmem_budget=48 << 20):
    """Largest (tm, th) fitting the VMEM budget; th is a multiple of 128 that
    divides H_pad, tm is a multiple of 8."""

    def footprint(tm, th):
        x_b = 2 * tm * D_pad * 2          # x tile, bf16, double-buffered
        w1_b = 2 * D_pad * th * 2         # W1 chunk
        w2_b = 2 * th * D_pad * 2         # W2 chunk
        bias_b = 2 * (th + D_pad) * 4     # biases (f32)
        o_b = 2 * tm * D_pad * out_itemsize
        acc_b = tm * D_pad * 4            # f32 accumulator scratch
        return x_b + w1_b + w2_b + bias_b + o_b + acc_b

    tm = min(block_rows, _round_up(M, 8))
    th = 128
    cand = 128
    while cand <= min(block_hidden, H_pad):
        if H_pad % cand == 0 and footprint(tm, cand) <= vmem_budget:
            th = cand
        cand += 128
    # If even the minimal hidden chunk blows the budget, shrink the row tile.
    while footprint(tm, th) > vmem_budget and tm > 8:
        tm = max(8, (tm // 2 + 7) // 8 * 8)
    return tm, th


@functools.partial(jax.jit, static_argnames=("block_rows", "block_hidden"))
def feed_forward(x, w1, b1, w2, b2, *, block_rows=256, block_hidden=512):
    """x: (B, T, D).  w1: (D, 4D), b1: (4D,), w2: (4D, D), b2: (D,).

    Weights are stored as (in_features, out_features), i.e. the transpose of
    PyTorch's nn.Linear.weight.  Matches eval-mode FeedForward (dropout == id).
    """
    B, T, D = x.shape
    H = w1.shape[1]
    M = B * T

    # Lane-dense padding (multiples of 128 on D and H, multiple of tile on M).
    D_pad = _round_up(D, 128)
    H_pad = _round_up(H, 128)
    tm, th = _pick_tiles(M, D_pad, H_pad, block_rows, block_hidden,
                         jnp.dtype(x.dtype).itemsize)
    M_pad = _round_up(M, tm)

    x2d = x.reshape(M, D)
    xp = jnp.pad(x2d, ((0, M_pad - M), (0, D_pad - D))).astype(jnp.bfloat16)
    w1p = jnp.pad(w1, ((0, D_pad - D), (0, H_pad - H))).astype(jnp.bfloat16)
    w2p = jnp.pad(w2, ((0, H_pad - H), (0, D_pad - D))).astype(jnp.bfloat16)
    b1p = jnp.pad(b1, (0, H_pad - H)).reshape(1, H_pad).astype(jnp.float32)
    b2p = jnp.pad(b2, (0, D_pad - D)).reshape(1, D_pad).astype(jnp.float32)

    grid = (M_pad // tm, H_pad // th)

    flops = 2 * M_pad * D_pad * H_pad * 2                      # two matmuls
    bytes_accessed = (xp.size * 2
                      + (M_pad // tm) * (w1p.size * 2 + w2p.size * 2)
                      + b1p.size * 4 + b2p.size * 4 + M_pad * D_pad * 4)
    cost = pl.CostEstimate(flops=flops, transcendentals=0,
                           bytes_accessed=bytes_accessed)

    out2d = pl.pallas_call(
        _ffn_kernel,
        out_shape=jax.ShapeDtypeStruct((M_pad, D_pad), x.dtype),
        grid_spec=pltpu.PrefetchScalarGridSpec(
            num_scalar_prefetch=0,
            grid=grid,
            in_specs=[
                pl.BlockSpec((tm, D_pad), lambda i, k: (i, 0)),   # x rows
                pl.BlockSpec((D_pad, th), lambda i, k: (0, k)),   # W1 col chunk
                pl.BlockSpec((1, th),     lambda i, k: (0, k)),   # b1 chunk
                pl.BlockSpec((th, D_pad), lambda i, k: (k, 0)),   # W2 row chunk
                pl.BlockSpec((1, D_pad),  lambda i, k: (0, 0)),   # b2
            ],
            out_specs=pl.BlockSpec((tm, D_pad), lambda i, k: (i, 0)),
            scratch_shapes=[pltpu.VMEM((tm, D_pad), jnp.float32)],
        ),
        compiler_params=pltpu.CompilerParams(
            dimension_semantics=("parallel", "arbitrary"),
            vmem_limit_bytes=64 << 20),
        cost_estimate=cost,
    )(xp, w1p, b1p, w2p, b2p)

    return out2d[:M, :D].reshape(B, T, D)


def init_params(key, embedding_dim):
    """Deterministic init mimicking nn.Linear (uniform(-1/sqrt(fan_in), +))."""
    D = embedding_dim
    H = 4 * D
    k1, k2, k3, k4 = jax.random.split(key, 4)
    bound1 = 1.0 / jnp.sqrt(D)
    bound2 = 1.0 / jnp.sqrt(H)
    w1 = jax.random.uniform(k1, (D, H), jnp.float32, -bound1, bound1)
    b1 = jax.random.uniform(k2, (H,), jnp.float32, -bound1, bound1)
    w2 = jax.random.uniform(k3, (H, D), jnp.float32, -bound2, bound2)
    b2 = jax.random.uniform(k4, (D,), jnp.float32, -bound2, bound2)
    return w1, b1, w2, b2


def _reference(x, w1, b1, w2, b2):
    B, T, D = x.shape
    y = jnp.maximum(x.reshape(-1, D) @ w1 + b1, 0.0) @ w2 + b2
    return y.reshape(B, T, D)


if __name__ == "__main__":
    key = jax.random.PRNGKey(0)
    kx, kp, kx2, kp2 = jax.random.split(key, 4)

    # Main small demo: (B, T, D) = (2, 8, 32).
    batch, context, embed = 2, 8, 32
    x = jax.random.normal(kx, (batch, context, embed), jnp.float32)
    w1, b1, w2, b2 = init_params(kp, embed)

    out = feed_forward(x, w1, b1, w2, b2)
    out = jax.block_until_ready(out)

    ref = _reference(x, w1, b1, w2, b2)
    assert out.shape == (batch, context, embed)
    # bf16 MXU inputs -> looser tolerance vs f32 reference.
    assert jnp.allclose(out, ref, atol=5e-2, rtol=5e-2), (
        float(jnp.max(jnp.abs(out - ref))))

    # Second check: non-128-multiple dims + multiple hidden chunks (padding +
    # accumulator path).
    b2_, t2_, e2_ = 3, 5, 48
    x2 = jax.random.normal(kx2, (b2_, t2_, e2_), jnp.float32)
    p2 = init_params(kp2, e2_)
    out2 = jax.block_until_ready(
        feed_forward(x2, *p2, block_rows=64, block_hidden=128))
    ref2 = _reference(x2, *p2)
    assert out2.shape == (b2_, t2_, e2_)
    assert jnp.allclose(out2, ref2, atol=5e-2, rtol=5e-2), (
        float(jnp.max(jnp.abs(out2 - ref2))))

    print("KERNEL_OK")
</pallas_src>

<mosaic_0001>
module attributes {stable_mosaic.version = 11 : i64} {
  func.func @_ffn_kernel(%arg0: i32, %arg1: i32, %arg2: memref<16x128xbf16, #tpu.memory_space<vmem>>, %arg3: memref<128x128xbf16, #tpu.memory_space<vmem>>, %arg4: memref<1x128xf32, #tpu.memory_space<vmem>>, %arg5: memref<128x128xbf16, #tpu.memory_space<vmem>>, %arg6: memref<1x128xf32, #tpu.memory_space<vmem>>, %arg7: memref<16x128xf32, #tpu.memory_space<vmem>>, %arg8: memref<16x128xf32, #tpu.memory_space<vmem>>) attributes {dimension_semantics = [#tpu.dimension_semantics<parallel>, #tpu.dimension_semantics<arbitrary>], iteration_bounds = array<i64: 1, 1>, scalar_prefetch = 0 : i64, scratch_operands = 1 : i64, tpu.core_type = #tpu.core_type<tc>, window_params = [{transform_indices = @transform_0, window_bounds = array<i64: 16, 128>}, {transform_indices = @transform_1, window_bounds = array<i64: 128, 128>}, {transform_indices = @transform_2, window_bounds = array<i64: 1, 128>}, {transform_indices = @transform_3, window_bounds = array<i64: 128, 128>}, {pipeline_mode = #tpu.pipeline_mode<synchronous>, transform_indices = @transform_4, window_bounds = array<i64: 1, 128>}, {transform_indices = @transform_5, window_bounds = array<i64: 16, 128>}]} {
    %c0_i32 = arith.constant 0 : i32
    %0 = arith.cmpi eq, %arg1, %c0_i32 : i32
    %1 = arith.extui %0 : i1 to i32
    %c0_i32_0 = arith.constant 0 : i32
    %2 = arith.cmpi ne, %1, %c0_i32_0 : i32
    scf.if %2 {
      %cst_16 = arith.constant 0.000000e+00 : f32
      %20 = vector.broadcast %cst_16 : f32 to vector<16x128xf32>
      %c0_17 = arith.constant 0 : index
      %c0_18 = arith.constant 0 : index
      %21 = vector.load %arg8[%c0_17, %c0_18] : memref<16x128xf32, #tpu.memory_space<vmem>>, vector<16x128xf32>
      tpu.vector_store %arg8[%c0_17, %c0_18], %20 {strides = array<i32>} : memref<16x128xf32, #tpu.memory_space<vmem>>, vector<16x128xf32>,
    } else {
    }
    %c0 = arith.constant 0 : index
    %c0_1 = arith.constant 0 : index
    %3 = vector.load %arg2[%c0, %c0_1] : memref<16x128xbf16, #tpu.memory_space<vmem>>, vector<16x128xbf16>
    %c0_2 = arith.constant 0 : index
    %c0_3 = arith.constant 0 : index
    %4 = vector.load %arg3[%c0_2, %c0_3] : memref<128x128xbf16, #tpu.memory_space<vmem>>, vector<128x128xbf16>
    %cst = arith.constant dense<0.000000e+00> : vector<16x128xf32>
    %5 = tpu.matmul %3, %4, %cst {dimension_numbers = #tpu.dot_dimension_numbers<[1], [0], [0], [1], [0, 0, 1, 1], [], []>} : vector<16x128xbf16>, vector<128x128xbf16>, vector<16x128xf32> -> vector<16x128xf32>
    %c0_4 = arith.constant 0 : index
    %c0_5 = arith.constant 0 : index
    %6 = vector.load %arg4[%c0_4, %c0_5] : memref<1x128xf32, #tpu.memory_space<vmem>>, vector<1x128xf32>
    %7 = vector.broadcast %6 : vector<1x128xf32> to vector<16x128xf32>
    %8 = arith.addf %5, %7 : vector<16x128xf32>
    %cst_6 = arith.constant 0.000000e+00 : f32
    %9 = vector.broadcast %cst_6 : f32 to vector<16x128xf32>
    %10 = arith.maximumf %8, %9 : vector<16x128xf32>
    %c0_7 = arith.constant 0 : index
    %c0_8 = arith.constant 0 : index
    %11 = vector.load %arg8[%c0_7, %c0_8] : memref<16x128xf32, #tpu.memory_space<vmem>>, vector<16x128xf32>
    %12 = arith.truncf %10 : vector<16x128xf32> to vector<16x128xbf16>
    %c0_9 = arith.constant 0 : index
    %c0_10 = arith.constant 0 : index
    %13 = vector.load %arg5[%c0_9, %c0_10] : memref<128x128xbf16, #tpu.memory_space<vmem>>, vector<128x128xbf16>
    %cst_11 = arith.constant dense<0.000000e+00> : vector<16x128xf32>
    %14 = tpu.matmul %12, %13, %cst_11 {dimension_numbers = #tpu.dot_dimension_numbers<[1], [0], [0], [1], [0, 0, 1, 1], [], []>} : vector<16x128xbf16>, vector<128x128xbf16>, vector<16x128xf32> -> vector<16x128xf32>
    %15 = arith.addf %11, %14 : vector<16x128xf32>
    %c0_12 = arith.constant 0 : index
    %c0_13 = arith.constant 0 : index
    %16 = vector.load %arg8[%c0_12, %c0_13] : memref<16x128xf32, #tpu.memory_space<vmem>>, vector<16x128xf32>
    tpu.vector_store %arg8[%c0_12, %c0_13], %15 {strides = array<i32>} : memref<16x128xf32, #tpu.memory_space<vmem>>, vector<16x128xf32>,
    %c0_i32_14 = arith.constant 0 : i32
    %17 = arith.cmpi eq, %arg1, %c0_i32_14 : i32
    %18 = arith.extui %17 : i1 to i32
    %c0_i32_15 = arith.constant 0 : i32
    %19 = arith.cmpi ne, %18, %c0_i32_15 : i32
    scf.if %19 {
      %c0_16 = arith.constant 0 : index
      %c0_17 = arith.constant 0 : index
      %20 = vector.load %arg8[%c0_16, %c0_17] : memref<16x128xf32, #tpu.memory_space<vmem>>, vector<16x128xf32>
      %c0_18 = arith.constant 0 : index
      %c0_19 = arith.constant 0 : index
      %21 = vector.load %arg6[%c0_18, %c0_19] : memref<1x128xf32, #tpu.memory_space<vmem>>, vector<1x128xf32>
      %22 = vector.broadcast %21 : vector<1x128xf32> to vector<16x128xf32>
      %23 = arith.addf %20, %22 : vector<16x128xf32>
      %c0_20 = arith.constant 0 : index
      %c0_21 = arith.constant 0 : index
      %24 = vector.load %arg7[%c0_20, %c0_21] : memref<16x128xf32, #tpu.memory_space<vmem>>, vector<16x128xf32>
      tpu.vector_store %arg7[%c0_20, %c0_21], %23 {strides = array<i32>} : memref<16x128xf32, #tpu.memory_space<vmem>>, vector<16x128xf32>,
    } else {
    }
    return
  }
  func.func @transform_0(%arg0: i32, %arg1: i32) -> (i32, i32) {
    %c0_i32 = arith.constant 0 : i32
    %c0_i32_0 = arith.constant 0 : i32
    return %arg0, %c0_i32 : i32, i32
  }
  func.func @transform_1(%arg0: i32, %arg1: i32) -> (i32, i32) {
    %c0_i32 = arith.constant 0 : i32
    %c0_i32_0 = arith.constant 0 : i32
    return %c0_i32, %arg1 : i32, i32
  }
  func.func @transform_2(%arg0: i32, %arg1: i32) -> (i32, i32) {
    %c0_i32 = arith.constant 0 : i32
    %c0_i32_0 = arith.constant 0 : i32
    return %c0_i32, %arg1 : i32, i32
  }
  func.func @transform_3(%arg0: i32, %arg1: i32) -> (i32, i32) {
    %c0_i32 = arith.constant 0 : i32
    %c0_i32_0 = arith.constant 0 : i32
    return %arg1, %c0_i32 : i32, i32
  }
  func.func @transform_4(%arg0: i32, %arg1: i32) -> (i32, i32) {
    %c0_i32 = arith.constant 0 : i32
    %c0_i32_0 = arith.constant 0 : i32
    %c0_i32_1 = arith.constant 0 : i32
    return %c0_i32, %c0_i32_0 : i32, i32
  }
  func.func @transform_5(%arg0: i32, %arg1: i32) -> (i32, i32) {
    %c0_i32 = arith.constant 0 : i32
    %c0_i32_0 = arith.constant 0 : i32
    return %arg0, %c0_i32 : i32, i32
  }
}

</mosaic_0001>

<bundles_post_ra>
// kernel: feed_forward.1
= control target key start
LH: loop header
LB: loop body
LE: loop exit
PB: predicated region body
PF: predicated region fallthrough
CT: control target
= control target key end

     0   :  { %v377_v0 = vmov 0.0   ;;  %vm378_vm0 = vmmov 0   ;;  %s472_s1 = inlined_call_operand.vmem [shape: bf16[128,128], index: 1, kind: input, shape index: {}]   ;;  %s473_s3 = inlined_call_operand.vmem [shape: bf16[128,128], index: 3, kind: input, shape index: {}]   ;;  %s474_s0 = inlined_call_operand.vmem [shape: bf16[16,128], index: 0, kind: input, shape index: {}]   ;;  %s475_s2 = inlined_call_operand.vmem [shape: f32[1,128], index: 2, kind: input, shape index: {}]   ;;  %s476_s4 = inlined_call_operand.vmem [shape: f32[1,128], index: 4, kind: input, shape index: {}]   ;;  %s477_s5 = inlined_call_operand.vmem [shape: f32[16,128], index: 5, kind: output, shape index: {}]  }
   0x1   :  { %318 = vmatprep.subr.bf16.mxu0 %v377_v0  ;;  %v360_v1 = vld [vmem:[%s472_s1 + $0x38] sm:$0xff]   ;;  %334 = vmatprep.mubr.msk.bf16.mxu0 %vm378_vm0, %v377_v0  ;;  %v361_v2 = vld [vmem:[%s472_s1 + $0x30] sm:$0xff]   ;;  %v362_v3 = vld [vmem:[%s472_s1 + $0x28] sm:$0xff]  }
   0x2   :  { %338 = vmatprep.subr.bf16.mxu1 %v377_v0  ;;  %354 = vmatprep.mubr.msk.bf16.mxu1 %vm378_vm0, %v377_v0  ;;  %v369_v4 = vld [vmem:[%s473_s3 + $0x38] sm:$0xff]   ;;  %v363_v5 = vld [vmem:[%s472_s1 + $0x20] sm:$0xff]   ;;  %v370_v6 = vld [vmem:[%s473_s3 + $0x30] sm:$0xff]  }
   0x3   :  { %319 = vmatpush3.bf16.msra.mxu0 %v360_v1  ;;  %339 = vmatpush3.bf16.msra.mxu1 %v369_v4  ;;  %v364_v7 = vld [vmem:[%s472_s1 + $0x18] sm:$0xff]   ;;  %v371_v8 = vld [vmem:[%s473_s3 + $0x28] sm:$0xff]   ;;  %v365_v9 = vld [vmem:[%s472_s1 + $0x10] sm:$0xff]  }
   0x4   :  { %320 = vmatprep.subr.bf16.mxu0 %v377_v0  ;;  %340 = vmatprep.subr.bf16.mxu1 %v377_v0  ;;  %v372_v10 = vld [vmem:[%s473_s3 + $0x20] sm:$0xff]   ;;  %v366_v11 = vld [vmem:[%s472_s1 + $0x8] sm:$0xff]   ;;  %v373_v12 = vld [vmem:[%s473_s3 + $0x18] sm:$0xff]  }
   0x5   :  { %v367_v13 = vld [vmem:[%s472_s1] sm:$0xff]   ;;  %v374_v15 = vld [vmem:[%s473_s3 + $0x10] sm:$0xff]   ;;  %v375_v16 = vld [vmem:[%s473_s3 + $0x8] sm:$0xff]  }
   0x6   :  { %v368_v14 = vld [vmem:[%s474_s0] sm:$0xff]  }
   0x7   :  { %321 = vmatpush3.bf16.msra.mxu0 %v361_v2  ;;  %341 = vmatpush3.bf16.msra.mxu1 %v370_v6  ;;  %v376_v17 = vld [vmem:[%s473_s3] sm:$0xff]  }
   0x8   :  { %322 = vmatprep.subr.bf16.mxu0 %v377_v0  ;;  %342 = vmatprep.subr.bf16.mxu1 %v377_v0  ;;  %v281_v18 = vld [vmem:[%s475_s2] ss:$0 sm:$0xff] }
   0x9   :  { %v299_v28 = vld [vmem:[%s476_s4] ss:$0 sm:$0xff] }
   0xb   :  { %323 = vmatpush3.bf16.msra.mxu0 %v362_v3  ;;  %343 = vmatpush3.bf16.msra.mxu1 %v371_v8 }
   0xc   :  { %324 = vmatprep.subr.bf16.mxu0 %v377_v0  ;;  %344 = vmatprep.subr.bf16.mxu1 %v377_v0 }
   0xf   :  { %325 = vmatpush3.bf16.msra.mxu0 %v363_v5  ;;  %345 = vmatpush3.bf16.msra.mxu1 %v372_v10 }
  0x10   :  { %326 = vmatprep.subr.bf16.mxu0 %v377_v0  ;;  %346 = vmatprep.subr.bf16.mxu1 %v377_v0 }
  0x13   :  { %327 = vmatpush3.bf16.msra.mxu0 %v364_v7  ;;  %347 = vmatpush3.bf16.msra.mxu1 %v373_v12 }
  0x14   :  { %328 = vmatprep.subr.bf16.mxu0 %v377_v0  ;;  %348 = vmatprep.subr.bf16.mxu1 %v377_v0 }
  0x17   :  { %329 = vmatpush3.bf16.msra.mxu0 %v365_v9  ;;  %349 = vmatpush3.bf16.msra.mxu1 %v374_v15 }
  0x18   :  { %330 = vmatprep.subr.bf16.mxu0 %v377_v0  ;;  %350 = vmatprep.subr.bf16.mxu1 %v377_v0 }
  0x1b   :  { %331 = vmatpush3.bf16.msra.mxu0 %v366_v11  ;;  %351 = vmatpush3.bf16.msra.mxu1 %v375_v16 }
  0x1c   :  { %332 = vmatprep.subr.bf16.mxu0 %v377_v0  ;;  %352 = vmatprep.subr.bf16.mxu1 %v377_v0 }
  0x1f   :  { %333 = vmatpush3.bf16.msra.mxu0 %v367_v13  ;;  %353 = vmatpush3.bf16.msra.mxu1 %v376_v17 }
  0x22   :  { %335 = vmatmul.mubr.bf16.vlgmr.msra.gmra.mxu0 %v368_v14 }
  0xe2   :  { %v140_v19 = vpop.f32.mrf.mxu0 }
  0xe3   :  { %v141_v21 = vadd.f32 %v281_v18, %v140_v19 }
  0xe4   :  { %v336_v20 = vpop.f32.mrf.mxu0 }
  0xe5   :  { %v147_v25 = vmax.f32 %v141_v21, 0.0 }
  0xe6   :  { %v143_v22 = vpop.f32.mrf.mxu0 }
  0xe7   :  { %v144_v23 = vadd.f32 %v281_v18, %v143_v22 }
  0xe8   :  { %v337_v24 = vpop.f32.mrf.mxu0 }
  0xe9   :  { %v148_v26 = vmax.f32 %v144_v23, 0.0 }
  0xeb   :  { %v151_v27 = vpack.c.bf16 %v148_v26, %v147_v25 }
  0xed   :  { %355 = vmatmul.mubr.bf16.vlgmr.msra.gmra.mxu1 %v151_v27 }
 0x1ad   :  { %v250_v29 = vpop.f32.mrf.mxu1 }
 0x1ae   :  { %v273_v30 = vadd.f32 %v299_v28, %v250_v29 }
 0x1af   :  { %v356_v31 = vpop.f32.mrf.mxu1 }
 0x1b0   :  { %275 = vst [vmem:[%s477_s5] sm:$0xff] %v273_v30 }
 0x1b1   :  { %v253_v32 = vpop.f32.mrf.mxu1 }
 0x1b2   :  { %v274_v33 = vadd.f32 %v299_v28, %v253_v32 }
 0x1b3   :  { %v357_v34 = vpop.f32.mrf.mxu1 }
 0x1b4   :  { %276 = vst [vmem:[%s477_s5 + $0x8] sm:$0xff] %v274_v33 }

</bundles_post_ra>
